<compile_context>
chip_gen: v6e
topology: v6e:2x2x1
jax: 0.10.0
libtpu: 0.0.40
codegen_flags: <defaults>
</compile_context>

<pallas_src>
import functools

import jax
import jax.numpy as jnp
import numpy as np
from jax import lax
from jax.experimental import pallas as pl
from jax.experimental.pallas import tpu as pltpu

_LANE = 128  # TPU lane width; lane-dense K tiles must be multiples of this.


# ----------------------------- parameter setup (glue) ------------------------

def _isometrize(w, leg_type):
    """Stand-in for func.normal: make w an isometry (w^T w = I), grouping the
    first `bond_in` legs as rows and the remaining legs as columns."""
    bond_in, _ = leg_type
    shape = w.shape
    rows = int(np.prod(shape[:bond_in]))
    cols = int(np.prod(shape[bond_in:]))
    q, _ = jnp.linalg.qr(w.reshape(rows, cols))
    return q.reshape(shape)


def build_kraus(w, u):
    """Stacked Kraus tensors of the three descending networks (float32).

    Returns A with shape (B, S, Ad) = (3*chi_in^4, chi_in^2, chi_out^2) such
    that  rho_low = (1/3) * sum_b  A[b] @ rho_mat @ A[b]^T .
    Index letters: s,t = open fine sites; c,d,e,f = traced environment legs;
    o,p = legs contracted between u and the two w's; a,b = coarse legs.
    """
    chi = w.shape[0]
    chi_out = w.shape[3]
    # pair (3a, 3a+1):  left w fully traced, open sites = u.in2 and w_right.leg2
    A1 = jnp.einsum('cdoa,esop,ptfb->stcdefab', w, u, w)
    # pair (3a+1, 3a+2): open sites = w_left.leg2 and u.in1
    A2 = jnp.einsum('csoa,tdop,pefb->stcdefab', w, u, w)
    # pair (3a+2, 3a+3): both open sites are the inputs of u
    A3 = jnp.einsum('cdoa,stop,pefb->stcdefab', w, u, w)

    def pack(Ak):
        Ak = Ak.reshape(chi * chi, chi ** 4, chi_out * chi_out)   # (S, E, Ad)
        return jnp.transpose(Ak, (1, 0, 2))                       # (E, S, Ad)

    return jnp.concatenate([pack(A1), pack(A2), pack(A3)], axis=0)


def _build_streams(rho, w, u, stream_dtype=jnp.bfloat16):
    """Lane-dense bf16 streams for the kernel.

    A2d[s, b*Ad + a] = A[b, s, a]
    C2d[s, b*Ad + x] = sum_a A[b, s, a] * rho[a, x]      (A @ rho, XLA glue)
    so that   rho_low = (1/3) * C2d @ A2d^T   (K = B*Ad contraction).
    """
    chi = w.shape[0]
    chi_out = w.shape[3]
    S, Ad = chi * chi, chi_out * chi_out
    A = build_kraus(w, u)                                    # (B, S, Ad) f32
    rhom = rho.reshape(Ad, Ad).astype(jnp.float32)
    C = jnp.einsum('bsa,ax->bsx', A, rhom,
                   precision=lax.Precision.HIGHEST)          # (B, S, Ad) f32
    A2d = jnp.transpose(A, (1, 0, 2)).reshape(S, -1).astype(stream_dtype)
    C2d = jnp.transpose(C, (1, 0, 2)).reshape(S, -1).astype(stream_dtype)
    return A2d, C2d


def _largest_divisor_leq(n, cap):
    cap = max(1, min(n, cap))
    for c in range(cap, 0, -1):
        if n % c == 0:
            return c
    return 1


# ----------------------------- Pallas kernel (hot path) ----------------------

def _gram_kernel(c_ref, a_ref, o_ref, *, nk):
    """out[s,t] (+)= sum_k C[s,k] * A[t,k] for this core's K tile.

    c_ref, a_ref: (S, tk) bf16 lane-dense tiles of the C and A streams.
    o_ref:        (1, S, S) f32 per-core partial, resident across the K axis
                  (output block index constant along grid axis 1, which MUST
                  stay "arbitrary"/sequential for the accumulation to hold).
    """
    # Single long-K bf16 MXU matmul, f32 accumulation inside the MXU.
    partial = lax.dot_general(
        c_ref[...], a_ref[...],
        dimension_numbers=(((1,), (1,)), ((), ())),   # contract K of both
        preferred_element_type=jnp.float32)

    if nk == 1:
        # Specialized single-K-tile path: no init, no read-modify-write.
        o_ref[0] = partial
    else:
        k = pl.program_id(1)

        @pl.when(k == 0)
        def _():
            o_ref[0] = partial

        @pl.when(k > 0)
        def _():
            o_ref[0] += partial


def des_ternary(rho, w, u, *, num_core_splits=1):
    """Ternary MERA two-site descending superoperator (Pallas hot path).

    num_core_splits: keep 1 on v5e/v6e (single TensorCore) and for small chi;
                     set 2 on v7x for chi >= 6 so both TensorCores share the
                     K reduction (per-core partials summed in glue).
    """
    chi = w.shape[0]
    chi_out = w.shape[3]
    S = chi * chi

    A2d, C2d = _build_streams(rho, w, u)                 # (S, K) bf16 each
    K = A2d.shape[1]

    # Zero-pad K so every core gets a lane-aligned (multiple of 128) slice;
    # zero columns add nothing to the contraction.
    kq = _LANE * num_core_splits
    K_pad = ((K + kq - 1) // kq) * kq
    if K_pad != K:
        A2d = jnp.pad(A2d, ((0, 0), (0, K_pad - K)))
        C2d = jnp.pad(C2d, ((0, 0), (0, K_pad - K)))
    K_core = K_pad // num_core_splits

    # VMEM budgeting from the actual chip (v7x: 64 MiB, v5e/v6e: 128 MiB).
    try:
        vmem_cap = int(pltpu.get_tpu_info().vmem_capacity_bytes)
    except Exception:
        vmem_cap = 64 << 20
    vmem_limit = max(32 << 20, min(vmem_cap * 3 // 4, 96 << 20))
    # 2 streams x 2 pipeline buffers per stream, keep ~2x headroom.
    tile_budget = vmem_limit // 8
    units = K_core // _LANE
    max_units = max(1, tile_budget // (S * 2 * _LANE))   # bf16 columns of height S
    tk_units = _largest_divisor_leq(units, max_units)
    tk = tk_units * _LANE
    ktiles = units // tk_units                            # 1 for chi=4

    kernel = functools.partial(_gram_kernel, nk=ktiles)

    partials = pl.pallas_call(
        kernel,
        out_shape=jax.ShapeDtypeStruct((num_core_splits, S, S), jnp.float32),
        grid_spec=pltpu.PrefetchScalarGridSpec(
            num_scalar_prefetch=0,
            grid=(num_core_splits, ktiles),                 # chi=4 -> (1, 1)
            in_specs=[
                pl.BlockSpec((S, tk), lambda c, k: (0, c * ktiles + k)),  # C
                pl.BlockSpec((S, tk), lambda c, k: (0, c * ktiles + k)),  # A
            ],
            out_specs=pl.BlockSpec((1, S, S), lambda c, k: (c, 0, 0)),
        ),
        compiler_params=pltpu.CompilerParams(
            dimension_semantics=("parallel", "arbitrary"),
            vmem_limit_bytes=vmem_limit,
        ),
    )(C2d, A2d)

    # Per-core partials -> average over the three networks (cheap XLA glue).
    out = jnp.sum(partials, axis=0) * (1.0 / 3.0)
    return out.reshape(chi, chi, chi, chi)


# ----------------------------- module wrapper ---------------------------------

class SimpleTernaryPallas:
    """JAX/Pallas counterpart of layer.MERAlayer.SimpleTernary (forward only)."""

    def __init__(self, chi_in, chi_out, leg_type, dtype, key):
        if not isinstance(leg_type, tuple) or len(leg_type) != 2 or leg_type[0] < leg_type[1]:
            raise ValueError('w type should be a tuple with two elements: {}'.format(leg_type))
        assert chi_in > 0 and chi_out > 0
        self.chi_in, self.chi_out = chi_in, chi_out
        bond_in, bond_out = leg_type
        # u = identity disentangler, leg_type (2, 2)
        self.u = jnp.eye(chi_in ** 2, dtype=dtype).reshape(chi_in, chi_in, chi_in, chi_in)
        # w = random, then normalized to an isometry (func.normal stand-in)
        w = jax.random.normal(key, (chi_in,) * bond_in + (chi_out,) * bond_out, dtype=dtype)
        self.w = _isometrize(w, leg_type)

    def forward(self, rho, *, num_core_splits=1):
        return des_ternary(rho, self.w, self.u, num_core_splits=num_core_splits)


# ----------------------------- demo / self-check ------------------------------

if __name__ == "__main__":
    chi_in = chi_out = 4
    key = jax.random.PRNGKey(0)
    k_w, k_rho = jax.random.split(key)

    layer = SimpleTernaryPallas(chi_in, chi_out, (3, 1), jnp.float32, k_w)

    # deterministic positive, trace-1 two-site density matrix on the coarse lattice
    r = jax.random.normal(k_rho, (chi_out ** 2, chi_out ** 2), dtype=jnp.float32)
    rho_mat = r @ r.T
    rho_mat = rho_mat / jnp.trace(rho_mat)
    rho = rho_mat.reshape(chi_out, chi_out, chi_out, chi_out)

    out = jax.block_until_ready(layer.forward(rho))

    # Pure-JAX reference over the SAME bf16-quantized streams the kernel sees,
    # contracted in full f32 -> only accumulation-order differences remain.
    A2d, C2d = _build_streams(rho, layer.w, layer.u)
    ref = jnp.dot(C2d.astype(jnp.float32), A2d.astype(jnp.float32).T,
                  precision=lax.Precision.HIGHEST) / 3.0
    ref = ref.reshape(chi_in, chi_in, chi_in, chi_in)

    np.testing.assert_allclose(np.asarray(out), np.asarray(ref), rtol=2e-4, atol=1e-5)
    print("KERNEL_OK")
</pallas_src>

<mosaic_0001>
module attributes {stable_mosaic.version = 11 : i64} {
  func.func @_gram_kernel(%arg0: i32, %arg1: i32, %arg2: memref<16x12288xbf16, #tpu.memory_space<vmem>>, %arg3: memref<16x12288xbf16, #tpu.memory_space<vmem>>, %arg4: memref<1x16x16xf32, #tpu.memory_space<vmem>>) attributes {dimension_semantics = [#tpu.dimension_semantics<parallel>, #tpu.dimension_semantics<arbitrary>], iteration_bounds = array<i64: 1, 1>, scalar_prefetch = 0 : i64, scratch_operands = 0 : i64, tpu.core_type = #tpu.core_type<tc>, window_params = [{transform_indices = @transform_0, window_bounds = array<i64: 16, 12288>}, {transform_indices = @transform_1, window_bounds = array<i64: 16, 12288>}, {transform_indices = @transform_2, window_bounds = array<i64: 1, 16, 16>}]} {
    %c0 = arith.constant 0 : index
    %c0_0 = arith.constant 0 : index
    %0 = vector.load %arg2[%c0, %c0_0] : memref<16x12288xbf16, #tpu.memory_space<vmem>>, vector<16x12288xbf16>
    %c0_1 = arith.constant 0 : index
    %c0_2 = arith.constant 0 : index
    %1 = vector.load %arg3[%c0_1, %c0_2] : memref<16x12288xbf16, #tpu.memory_space<vmem>>, vector<16x12288xbf16>
    %cst = arith.constant dense<0.000000e+00> : vector<16x16xf32>
    %2 = tpu.matmul %0, %1, %cst {dimension_numbers = #tpu.dot_dimension_numbers<[1], [1], [0], [0], [0, 0, 1, 0], [], []>} : vector<16x12288xbf16>, vector<16x12288xbf16>, vector<16x16xf32> -> vector<16x16xf32>
    %c0_3 = arith.constant 0 : index
    %c0_4 = arith.constant 0 : index
    %c0_5 = arith.constant 0 : index
    %3 = vector.load %arg4[%c0_3, %c0_4, %c0_5] : memref<1x16x16xf32, #tpu.memory_space<vmem>>, vector<1x16x16xf32>
    %4 = vector.shape_cast %3 : vector<1x16x16xf32> to vector<16x16xf32>
    %5 = vector.shape_cast %2 : vector<16x16xf32> to vector<1x16x16xf32>
    tpu.vector_store %arg4[%c0_3, %c0_4, %c0_5], %5 {strides = array<i32>} : memref<1x16x16xf32, #tpu.memory_space<vmem>>, vector<1x16x16xf32>,
    return
  }
  func.func @transform_0(%arg0: i32, %arg1: i32) -> (i32, i32) {
    %c1_i32 = arith.constant 1 : i32
    %0 = arith.muli %arg0, %c1_i32 : i32
    %1 = arith.addi %0, %arg1 : i32
    %c0_i32 = arith.constant 0 : i32
    %c0_i32_0 = arith.constant 0 : i32
    return %c0_i32, %1 : i32, i32
  }
  func.func @transform_1(%arg0: i32, %arg1: i32) -> (i32, i32) {
    %c1_i32 = arith.constant 1 : i32
    %0 = arith.muli %arg0, %c1_i32 : i32
    %1 = arith.addi %0, %arg1 : i32
    %c0_i32 = arith.constant 0 : i32
    %c0_i32_0 = arith.constant 0 : i32
    return %c0_i32, %1 : i32, i32
  }
  func.func @transform_2(%arg0: i32, %arg1: i32) -> (i32, i32, i32) {
    %c0_i32 = arith.constant 0 : i32
    %c0_i32_0 = arith.constant 0 : i32
    %c0_i32_1 = arith.constant 0 : i32
    return %arg0, %c0_i32, %c0_i32_0 : i32, i32, i32
  }
}

</mosaic_0001>

<bundles_post_ra>
// kernel: tpu_custom_call.1
= control target key start
LH: loop header
LB: loop body
LE: loop exit
PB: predicated region body
PF: predicated region fallthrough
CT: control target
= control target key end

     0   :  { %7 = vsyncpa [#allocation3], 0  ;;  %s3490_s0 = inlined_call_operand.hbm [shape: bf16[16,12288], index: 0, kind: input, shape index: {}]   ;;  %s3491_s1 = inlined_call_operand.hbm [shape: bf16[16,12288], index: 1, kind: input, shape index: {}]   ;;  %s3492_s2 = inlined_call_operand.hbm [shape: f32[1,16,16], index: 2, kind: output, shape index: {}]  }
   0x1   :  { %8 = vsyncpa [#allocation6], 0 }
   0x2   :  { %9 = vsyncpa [#allocation4], 0  ;;  %s3459_s9 = smov [#allocation2]  }
   0x3   :  { %s19_s10 = sshll.u32 %s3459_s9, 4  ;;  %s20_s10 = int_to_ptr.vmem [resolvable:$true] %s19_s10 }
   0x4   :  { %s3401_s11 = scalar_lea.vmem %s20_s10, 12288  ;;  %p3406_p1 = scmp.lt.s32.totalorder %s20_s10, %s20_s10 }
   0x5   :  { %p3402_p0 = scmp.ne.s32.totalorder %s20_s10, %s3401_s11  ;;  %p3407_p2 = scmp.lt.s32.totalorder %s3401_s11, %s3401_s11 }
   0x7   :  { %p3408_p3 = por %p3407_p2, %p3406_p1 }
   0x9   :  { %p3409_p4 = pnand %p3408_p3, %p3402_p0 }
   0xb   :  { %3412 = shalt.err (!%p3409_p4)
}
   0xc   :  { %s3460_s12 = smov 6144   ;;  %s3461_s13 = smov 384  }
   0xd   :  { %25 = dma.hbm_to_vmem [thread:$0]  %s3490_s0, 12288, %s20_s10, [#allocation3], %s3460_s12, %s3460_s12, %s3461_s13  }
   0xe   :  { %s3462_s16 = smov [#allocation5]  }
   0xf   :  { %s35_s17 = sshll.u32 %s3462_s16, 4  ;;  %s36_s17 = int_to_ptr.vmem [resolvable:$true] %s35_s17 }
  0x10   :  { %s3421_s18 = scalar_lea.vmem %s36_s17, 12288  ;;  %p3426_p6 = scmp.lt.s32.totalorder %s36_s17, %s36_s17 }
  0x11   :  { %p3422_p5 = scmp.ne.s32.totalorder %s36_s17, %s3421_s18  ;;  %p3427_p7 = scmp.lt.s32.totalorder %s3421_s18, %s3421_s18 }
  0x13   :  { %p3428_p8 = por %p3427_p7, %p3426_p6 }
  0x15   :  { %p3429_p9 = pnand %p3428_p8, %p3422_p5 }
  0x17   :  { %3432 = shalt.err (!%p3429_p9)
}
  0x18   :  { %41 = dma.hbm_to_vmem [thread:$0]  %s3491_s1, 12288, %s36_s17, [#allocation6], %s3460_s12, %s3460_s12, %s3461_s13  }
  0x19   :  { %3453 = dma.done.wait [#allocation3], 12288  }
  0x1a   :  { %3454 = vsyncadd [#allocation3], 4294955008 }
  0x1b   :  { %3455 = dma.done.wait [#allocation6], 12288  }
  0x1c   :  { %3456 = vsyncadd [#allocation6], 4294955008  ;;  %v149_v0 = vld [vmem:[#allocation5] sm:$0xff]  ;;  %v150_v2 = vld [vmem:[#allocation5 + $0x8] sm:$0xff]  ;;  %vm3173_vm0 = vcmask 130048   ;;  %s3463_s0 = smov [#allocation7]  }
  0x1d   :  { %v197_v1 = vld [vmem:[#allocation5 + $0x180] sm:$0xff]  ;;  %v198_v4 = vld [vmem:[#allocation5 + $0x188] sm:$0xff]  ;;  %v151_v13 = vld [vmem:[#allocation5 + $0x10] sm:$0xff]  ;;  %s3181_s1 = sshll.u32 %s3463_s0, 4  ;;  %s3182_s1 = int_to_ptr.vmem [resolvable:$true] %s3181_s1 }
  0x1e   :  { %v3291_v3 = vcombine.high %v149_v0, %v197_v1  ;;  %v3290_v5 = vcombine.low %v149_v0, %v197_v1  ;;  %v53_v6 = vld [vmem:[#allocation2] sm:$0xff]  ;;  %v3293_v8 = vcombine.high %v150_v2, %v198_v4  ;;  %v3292_v9 = vcombine.low %v150_v2, %v198_v4  ;;  %v54_v11 = vld [vmem:[#allocation2 + $0x8] sm:$0xff]  ;;  %v199_v15 = vld [vmem:[#allocation5 + $0x190] sm:$0xff]  ;;  %s3433_s21 = scalar_lea.vmem %s3182_s1, 256  ;;  %p3438_p11 = scmp.lt.s32.totalorder %s3182_s1, %s3182_s1 }
  0x1f   :  { %v101_v7 = vld [vmem:[#allocation2 + $0x180] sm:$0xff]  ;;  %v102_v12 = vld [vmem:[#allocation2 + $0x188] sm:$0xff]  ;;  %v152_v16 = vld [vmem:[#allocation5 + $0x18] sm:$0xff]  ;;  %v3295_v18 = vcombine.high %v151_v13, %v199_v15  ;;  %v3294_v28 = vcombine.low %v151_v13, %v199_v15  ;;  %p3434_p10 = scmp.ne.s32.totalorder %s3182_s1, %s3433_s21  ;;  %p3439_p12 = scmp.lt.s32.totalorder %s3433_s21, %s3433_s21 }
  0x20   :  { %v3195_v10 = vcombine.high %v53_v6, %v101_v7  ;;  %1219 = vmatprep.subr.bf16.mxu0 %v3291_v3  ;;  %v3197_v14 = vcombine.high %v54_v11, %v102_v12  ;;  %v200_v17 = vld [vmem:[#allocation5 + $0x198] sm:$0xff]  ;;  %1260 = vmatprep.subr.bf16.mxu1 %v3293_v8  ;;  %v55_v20 = vld [vmem:[#allocation2 + $0x10] sm:$0xff]  ;;  %v3194_v23 = vcombine.low %v53_v6, %v101_v7  ;;  %v153_v25 = vld [vmem:[#allocation5 + $0x20] sm:$0xff] }
  0x21   :  { %1220 = vmatpush1.bf16.xpose.msra.mxu0 %v3290_v5  ;;  %1261 = vmatpush1.bf16.xpose.msra.mxu1 %v3292_v9  ;;  %v3297_v19 = vcombine.high %v152_v16, %v200_v17  ;;  %v103_v21 = vld [vmem:[#allocation2 + $0x190] sm:$0xff]  ;;  %v56_v22 = vld [vmem:[#allocation2 + $0x18] sm:$0xff]  ;;  %v201_v26 = vld [vmem:[#allocation5 + $0x1a0] sm:$0xff]  ;;  %v3196_v27 = vcombine.low %v54_v11, %v102_v12  ;;  %v3296_v31 = vcombine.low %v152_v16, %v200_v17  ;;  %p3440_p13 = por %p3439_p12, %p3438_p11 }
  0x22   :  { %1237 = vmatprep.mubr.bf16.mxu0 %v3195_v10  ;;  %1278 = vmatprep.mubr.bf16.mxu1 %v3197_v14  ;;  %v104_v24 = vld [vmem:[#allocation2 + $0x198] sm:$0xff]  ;;  %v154_v29 = vld [vmem:[#allocation5 + $0x28] sm:$0xff]  ;;  %v3199_v32 = vcombine.high %v55_v20, %v103_v21  ;;  %v3299_v34 = vcombine.high %v153_v25, %v201_v26  ;;  %v57_v36 = vld [vmem:[#allocation2 + $0x20] sm:$0xff]  ;;  %v3198_v39 = vcombine.low %v55_v20, %v103_v21 }
  0x23   :  { %1301 = vmatprep.subr.bf16.mxu0 %v3295_v18  ;;  %1342 = vmatprep.subr.bf16.mxu1 %v3297_v19  ;;  %v202_v30 = vld [vmem:[#allocation5 + $0x1a8] sm:$0xff]  ;;  %v3201_v33 = vcombine.high %v56_v22, %v104_v24  ;;  %v105_v37 = vld [vmem:[#allocation2 + $0x1a0] sm:$0xff]  ;;  %v155_v41 = vld [vmem:[#allocation5 + $0x30] sm:$0xff]  ;;  %v3200_v43 = vcombine.low %v56_v22, %v104_v24  ;;  %v3298_v44 = vcombine.low %v153_v25, %v201_v26  ;;  %p3441_p0 = pnand %p3440_p13, %p3434_p10 }
  0x24   :  { %v3301_v35 = vcombine.high %v154_v29, %v202_v30  ;;  %v58_v38 = vld [vmem:[#allocation2 + $0x28] sm:$0xff]  ;;  %v203_v42 = vld [vmem:[#allocation5 + $0x1b0] sm:$0xff]  ;;  %v156_v45 = vld [vmem:[#allocation5 + $0x38] sm:$0xff]  ;;  %v3300_v47 = vcombine.low %v154_v29, %v202_v30  ;;  %v3203_v48 = vcombine.high %v57_v36, %v105_v37  ;;  %v3202_v55 = vcombine.low %v57_v36, %v105_v37 }
  0x25   :  { %v106_v40 = vld [vmem:[#allocation2 + $0x1a8] sm:$0xff]  ;;  %v204_v46 = vld [vmem:[#allocation5 + $0x1b8] sm:$0xff]  ;;  %v3303_v50 = vcombine.high %v155_v41, %v203_v42  ;;  %v59_v52 = vld [vmem:[#allocation2 + $0x30] sm:$0xff]  ;;  %v3302_v60 = vcombine.low %v155_v41, %v203_v42 }
  0x26   :  { %v3205_v49 = vcombine.high %v58_v38, %v106_v40  ;;  %v3305_v51 = vcombine.high %v156_v45, %v204_v46  ;;  %v107_v53 = vld [vmem:[#allocation2 + $0x1b0] sm:$0xff]  ;;  %v60_v54 = vld [vmem:[#allocation2 + $0x38] sm:$0xff]  ;;  %v157_v57 = vld [vmem:[#allocation5 + $0x40] sm:$0xff]  ;;  %v3204_v59 = vcombine.low %v58_v38, %v106_v40  ;;  %v3304_v63 = vcombine.low %v156_v45, %v204_v46 }
  0x27   :  { %v108_v56 = vld [vmem:[#allocation2 + $0x1b8] sm:$0xff]  ;;  %v205_v58 = vld [vmem:[#allocation5 + $0x1c0] sm:$0xff]  ;;  %v158_v61 = vld [vmem:[#allocation5 + $0x48] sm:$0xff]  ;;  %v3207_v0 = vcombine.high %v59_v52, %v107_v53  ;;  %v3206_v7 = vcombine.low %v59_v52, %v107_v53 }
  0x28   :  { %1238 = vmatmul.mubr.bf16.vlgmr.msra.gmra.mxu0 %v3194_v23  ;;  %1279 = vmatmul.mubr.bf16.vlgmr.msra.gmra.mxu1 %v3196_v27  ;;  %v206_v62 = vld [vmem:[#allocation5 + $0x1c8] sm:$0xff]  ;;  %v3209_v1 = vcombine.high %v60_v54, %v108_v56  ;;  %v3307_v2 = vcombine.high %v157_v57, %v205_v58  ;;  %v61_v4 = vld [vmem:[#allocation2 + $0x40] sm:$0xff]  ;;  %v159_v9 = vld [vmem:[#allocation5 + $0x50] sm:$0xff]  ;;  %v3208_v11 = vcombine.low %v60_v54, %v108_v56 }
  0x29   :  { %1302 = vmatpush1.bf16.xpose.msra.mxu0 %v3294_v28  ;;  %1343 = vmatpush1.bf16.xpose.msra.mxu1 %v3296_v31  ;;  %v3309_v3 = vcombine.high %v158_v61, %v206_v62  ;;  %v109_v5 = vld [vmem:[#allocation2 + $0x1c0] sm:$0xff]  ;;  %v62_v6 = vld [vmem:[#allocation2 + $0x48] sm:$0xff]  ;;  %v207_v10 = vld [vmem:[#allocation5 + $0x1d0] sm:$0xff]  ;;  %v3306_v12 = vcombine.low %v157_v57, %v205_v58  ;;  %v3308_v15 = vcombine.low %v158_v61, %v206_v62 }
  0x2a   :  { %1319 = vmatprep.mubr.bf16.mxu0 %v3199_v32  ;;  %1360 = vmatprep.mubr.bf16.mxu1 %v3201_v33  ;;  %v110_v8 = vld [vmem:[#allocation2 + $0x1c8] sm:$0xff]  ;;  %v160_v13 = vld [vmem:[#allocation5 + $0x58] sm:$0xff]  ;;  %v3211_v16 = vcombine.high %v61_v4, %v109_v5  ;;  %v3311_v18 = vcombine.high %v159_v9, %v207_v10  ;;  %v63_v20 = vld [vmem:[#allocation2 + $0x50] sm:$0xff]  ;;  %v3210_v23 = vcombine.low %v61_v4, %v109_v5 }
  0x2b   :  { %1383 = vmatprep.subr.bf16.mxu0 %v3299_v34  ;;  %1424 = vmatprep.subr.bf16.mxu1 %v3301_v35  ;;  %v208_v14 = vld [vmem:[#allocation5 + $0x1d8] sm:$0xff]  ;;  %v3213_v17 = vcombine.high %v62_v6, %v110_v8  ;;  %v111_v21 = vld [vmem:[#allocation2 + $0x1d0] sm:$0xff]  ;;  %v161_v25 = vld [vmem:[#allocation5 + $0x60] sm:$0xff]  ;;  %v3212_v27 = vcombine.low %v62_v6, %v110_v8  ;;  %v3310_v28 = vcombine.low %v159_v9, %v207_v10 }
  0x2c   :  { %v3313_v19 = vcombine.high %v160_v13, %v208_v14  ;;  %v64_v22 = vld [vmem:[#allocation2 + $0x58] sm:$0xff]  ;;  %v209_v26 = vld [vmem:[#allocation5 + $0x1e0] sm:$0xff]  ;;  %v162_v29 = vld [vmem:[#allocation5 + $0x68] sm:$0xff]  ;;  %v3312_v31 = vcombine.low %v160_v13, %v208_v14  ;;  %v3215_v32 = vcombine.high %v63_v20, %v111_v21 }
  0x2d   :  { %v112_v24 = vld [vmem:[#allocation2 + $0x1d8] sm:$0xff]  ;;  %v210_v30 = vld [vmem:[#allocation5 + $0x1e8] sm:$0xff]  ;;  %v3315_v34 = vcombine.high %v161_v25, %v209_v26  ;;  %v65_v36 = vld [vmem:[#allocation2 + $0x60] sm:$0xff] }
  0x2e   :  { %v3217_v33 = vcombine.high %v64_v22, %v112_v24  ;;  %v3317_v35 = vcombine.high %v162_v29, %v210_v30  ;;  %v113_v37 = vld [vmem:[#allocation2 + $0x1e0] sm:$0xff]  ;;  %v66_v38 = vld [vmem:[#allocation2 + $0x68] sm:$0xff]  ;;  %v163_v41 = vld [vmem:[#allocation5 + $0x70] sm:$0xff] }
  0x2f   :  { %v114_v40 = vld [vmem:[#allocation2 + $0x1e8] sm:$0xff]  ;;  %v211_v42 = vld [vmem:[#allocation5 + $0x1f0] sm:$0xff]  ;;  %v164_v45 = vld [vmem:[#allocation5 + $0x78] sm:$0xff] }
  0x30   :  { %1320 = vmatmul.mubr.bf16.vlgmr.msra.gmra.mxu0 %v3198_v39  ;;  %1361 = vmatmul.mubr.bf16.vlgmr.msra.gmra.mxu1 %v3200_v43  ;;  %v3214_v39 = vcombine.low %v63_v20, %v111_v21  ;;  %v3216_v43 = vcombine.low %v64_v22, %v112_v24  ;;  %v212_v46 = vld [vmem:[#allocation5 + $0x1f8] sm:$0xff]  ;;  %v67_v52 = vld [vmem:[#allocation2 + $0x70] sm:$0xff]  ;;  %v165_v57 = vld [vmem:[#allocation5 + $0x80] sm:$0xff] }
  0x31   :  { %1384 = vmatpush1.bf16.xpose.msra.mxu0 %v3298_v44  ;;  %1425 = vmatpush1.bf16.xpose.msra.mxu1 %v3300_v47  ;;  %v3314_v44 = vcombine.low %v161_v25, %v209_v26  ;;  %v3316_v47 = vcombine.low %v162_v29, %v210_v30  ;;  %v115_v53 = vld [vmem:[#allocation2 + $0x1f0] sm:$0xff]  ;;  %v68_v54 = vld [vmem:[#allocation2 + $0x78] sm:$0xff]  ;;  %v213_v58 = vld [vmem:[#allocation5 + $0x200] sm:$0xff] }
  0x32   :  { %1401 = vmatprep.mubr.bf16.mxu0 %v3203_v48  ;;  %1442 = vmatprep.mubr.bf16.mxu1 %v3205_v49  ;;  %v3219_v48 = vcombine.high %v65_v36, %v113_v37  ;;  %v3221_v49 = vcombine.high %v66_v38, %v114_v40  ;;  %v116_v56 = vld [vmem:[#allocation2 + $0x1f8] sm:$0xff]  ;;  %v166_v61 = vld [vmem:[#allocation5 + $0x88] sm:$0xff]  ;;  %v69_v4 = vld [vmem:[#allocation2 + $0x80] sm:$0xff] }
  0x33   :  { %1465 = vmatprep.subr.bf16.mxu0 %v3303_v50  ;;  %1506 = vmatprep.subr.bf16.mxu1 %v3305_v51  ;;  %v3319_v50 = vcombine.high %v163_v41, %v211_v42  ;;  %v3321_v51 = vcombine.high %v164_v45, %v212_v46  ;;  %v214_v62 = vld [vmem:[#allocation5 + $0x208] sm:$0xff]  ;;  %v117_v5 = vld [vmem:[#allocation2 + $0x200] sm:$0xff]  ;;  %v167_v9 = vld [vmem:[#allocation5 + $0x90] sm:$0xff] }
  0x34   :  { %v70_v6 = vld [vmem:[#allocation2 + $0x88] sm:$0xff]  ;;  %v215_v10 = vld [vmem:[#allocation5 + $0x210] sm:$0xff]  ;;  %v168_v13 = vld [vmem:[#allocation5 + $0x98] sm:$0xff] }
  0x35   :  { %v118_v8 = vld [vmem:[#allocation2 + $0x208] sm:$0xff]  ;;  %v216_v14 = vld [vmem:[#allocation5 + $0x218] sm:$0xff]  ;;  %v71_v20 = vld [vmem:[#allocation2 + $0x90] sm:$0xff] }
  0x36   :  { %v119_v21 = vld [vmem:[#allocation2 + $0x210] sm:$0xff]  ;;  %v72_v22 = vld [vmem:[#allocation2 + $0x98] sm:$0xff]  ;;  %v169_v25 = vld [vmem:[#allocation5 + $0xa0] sm:$0xff] }
  0x37   :  { %v120_v24 = vld [vmem:[#allocation2 + $0x218] sm:$0xff]  ;;  %v217_v26 = vld [vmem:[#allocation5 + $0x220] sm:$0xff]  ;;  %v170_v29 = vld [vmem:[#allocation5 + $0xa8] sm:$0xff] }
  0x38   :  { %1402 = vmatmul.mubr.bf16.vlgmr.msra.gmra.mxu0 %v3202_v55  ;;  %1443 = vmatmul.mubr.bf16.vlgmr.msra.gmra.mxu1 %v3204_v59  ;;  %v3218_v55 = vcombine.low %v65_v36, %v113_v37  ;;  %v3220_v59 = vcombine.low %v66_v38, %v114_v40  ;;  %v218_v30 = vld [vmem:[#allocation5 + $0x228] sm:$0xff]  ;;  %v73_v36 = vld [vmem:[#allocation2 + $0xa0] sm:$0xff] }
  0x39   :  { %1466 = vmatpush1.bf16.xpose.msra.mxu0 %v3302_v60  ;;  %1507 = vmatpush1.bf16.xpose.msra.mxu1 %v3304_v63  ;;  %v3318_v60 = vcombine.low %v163_v41, %v211_v42  ;;  %v3320_v63 = vcombine.low %v164_v45, %v212_v46  ;;  %v121_v37 = vld [vmem:[#allocation2 + $0x220] sm:$0xff]  ;;  %v74_v38 = vld [vmem:[#allocation2 + $0xa8] sm:$0xff]  ;;  %v171_v41 = vld [vmem:[#allocation5 + $0xb0] sm:$0xff] }
  0x3a   :  { %1483 = vmatprep.mubr.bf16.mxu0 %v3207_v0  ;;  %1524 = vmatprep.mubr.bf16.mxu1 %v3209_v1  ;;  %v3223_v0 = vcombine.high %v67_v52, %v115_v53  ;;  %v3225_v1 = vcombine.high %v68_v54, %v116_v56  ;;  %v122_v40 = vld [vmem:[#allocation2 + $0x228] sm:$0xff]  ;;  %v219_v42 = vld [vmem:[#allocation5 + $0x230] sm:$0xff]  ;;  %v172_v45 = vld [vmem:[#allocation5 + $0xb8] sm:$0xff] }
  0x3b   :  { %1547 = vmatprep.subr.bf16.mxu0 %v3307_v2  ;;  %1588 = vmatprep.subr.bf16.mxu1 %v3309_v3  ;;  %v3323_v2 = vcombine.high %v165_v57, %v213_v58  ;;  %v3325_v3 = vcombine.high %v166_v61, %v214_v62  ;;  %v220_v46 = vld [vmem:[#allocation5 + $0x238] sm:$0xff] }
  0x40   :  { %1484 = vmatmul.mubr.bf16.vlgmr.msra.gmra.mxu0 %v3206_v7  ;;  %1525 = vmatmul.mubr.bf16.vlgmr.msra.gmra.mxu1 %v3208_v11  ;;  %v3222_v7 = vcombine.low %v67_v52, %v115_v53  ;;  %v3224_v11 = vcombine.low %v68_v54, %v116_v56  ;;  %v75_v52 = vld [vmem:[#allocation2 + $0xb0] sm:$0xff]  ;;  %v76_v54 = vld [vmem:[#allocation2 + $0xb8] sm:$0xff] }
  0x41   :  { %1548 = vmatpush1.bf16.xpose.msra.mxu0 %v3306_v12  ;;  %1589 = vmatpush1.bf16.xpose.msra.mxu1 %v3308_v15  ;;  %v3322_v12 = vcombine.low %v165_v57, %v213_v58  ;;  %v3324_v15 = vcombine.low %v166_v61, %v214_v62  ;;  %v123_v53 = vld [vmem:[#allocation2 + $0x230] sm:$0xff]  ;;  %v124_v56 = vld [vmem:[#allocation2 + $0x238] sm:$0xff]  ;;  %v173_v57 = vld [vmem:[#allocation5 + $0xc0] sm:$0xff] }
  0x42   :  { %1565 = vmatprep.mubr.bf16.mxu0 %v3211_v16  ;;  %1606 = vmatprep.mubr.bf16.mxu1 %v3213_v17  ;;  %v3227_v16 = vcombine.high %v69_v4, %v117_v5  ;;  %v3229_v17 = vcombine.high %v70_v6, %v118_v8  ;;  %v221_v58 = vld [vmem:[#allocation5 + $0x240] sm:$0xff]  ;;  %v174_v61 = vld [vmem:[#allocation5 + $0xc8] sm:$0xff] }
  0x43   :  { %1629 = vmatprep.subr.bf16.mxu0 %v3311_v18  ;;  %1670 = vmatprep.subr.bf16.mxu1 %v3313_v19  ;;  %v3327_v18 = vcombine.high %v167_v9, %v215_v10  ;;  %v3329_v19 = vcombine.high %v168_v13, %v216_v14  ;;  %v222_v62 = vld [vmem:[#allocation5 + $0x248] sm:$0xff] }
  0x48   :  { %1566 = vmatmul.mubr.bf16.vlgmr.msra.gmra.mxu0 %v3210_v23  ;;  %1607 = vmatmul.mubr.bf16.vlgmr.msra.gmra.mxu1 %v3212_v27  ;;  %v3226_v23 = vcombine.low %v69_v4, %v117_v5  ;;  %v3228_v27 = vcombine.low %v70_v6, %v118_v8  ;;  %v77_v4 = vld [vmem:[#allocation2 + $0xc0] sm:$0xff]  ;;  %v78_v6 = vld [vmem:[#allocation2 + $0xc8] sm:$0xff] }
  0x49   :  { %1630 = vmatpush1.bf16.xpose.msra.mxu0 %v3310_v28  ;;  %1671 = vmatpush1.bf16.xpose.msra.mxu1 %v3312_v31  ;;  %v3326_v28 = vcombine.low %v167_v9, %v215_v10  ;;  %v3328_v31 = vcombine.low %v168_v13, %v216_v14  ;;  %v125_v5 = vld [vmem:[#allocation2 + $0x240] sm:$0xff]  ;;  %v126_v8 = vld [vmem:[#allocation2 + $0x248] sm:$0xff]  ;;  %v175_v9 = vld [vmem:[#allocation5 + $0xd0] sm:$0xff] }
  0x4a   :  { %1647 = vmatprep.mubr.bf16.mxu0 %v3215_v32  ;;  %1688 = vmatprep.mubr.bf16.mxu1 %v3217_v33  ;;  %v3231_v32 = vcombine.high %v71_v20, %v119_v21  ;;  %v3233_v33 = vcombine.high %v72_v22, %v120_v24  ;;  %v223_v10 = vld [vmem:[#allocation5 + $0x250] sm:$0xff]  ;;  %v176_v13 = vld [vmem:[#allocation5 + $0xd8] sm:$0xff] }
  0x4b   :  { %1711 = vmatprep.subr.bf16.mxu0 %v3315_v34  ;;  %1752 = vmatprep.subr.bf16.mxu1 %v3317_v35  ;;  %v3331_v34 = vcombine.high %v169_v25, %v217_v26  ;;  %v3333_v35 = vcombine.high %v170_v29, %v218_v30  ;;  %v224_v14 = vld [vmem:[#allocation5 + $0x258] sm:$0xff] }
  0x50   :  { %1648 = vmatmul.mubr.bf16.vlgmr.msra.gmra.mxu0 %v3214_v39  ;;  %1689 = vmatmul.mubr.bf16.vlgmr.msra.gmra.mxu1 %v3216_v43  ;;  %v3230_v39 = vcombine.low %v71_v20, %v119_v21  ;;  %v3232_v43 = vcombine.low %v72_v22, %v120_v24  ;;  %v79_v20 = vld [vmem:[#allocation2 + $0xd0] sm:$0xff]  ;;  %v80_v22 = vld [vmem:[#allocation2 + $0xd8] sm:$0xff] }
  0x51   :  { %1712 = vmatpush1.bf16.xpose.msra.mxu0 %v3314_v44  ;;  %1753 = vmatpush1.bf16.xpose.msra.mxu1 %v3316_v47  ;;  %v3330_v44 = vcombine.low %v169_v25, %v217_v26  ;;  %v3332_v47 = vcombine.low %v170_v29, %v218_v30  ;;  %v127_v21 = vld [vmem:[#allocation2 + $0x250] sm:$0xff]  ;;  %v128_v24 = vld [vmem:[#allocation2 + $0x258] sm:$0xff]  ;;  %v177_v25 = vld [vmem:[#allocation5 + $0xe0] sm:$0xff] }
  0x52   :  { %1729 = vmatprep.mubr.bf16.mxu0 %v3219_v48  ;;  %1770 = vmatprep.mubr.bf16.mxu1 %v3221_v49  ;;  %v3235_v48 = vcombine.high %v73_v36, %v121_v37  ;;  %v3237_v49 = vcombine.high %v74_v38, %v122_v40  ;;  %v225_v26 = vld [vmem:[#allocation5 + $0x260] sm:$0xff]  ;;  %v178_v29 = vld [vmem:[#allocation5 + $0xe8] sm:$0xff] }
  0x53   :  { %1793 = vmatprep.subr.bf16.mxu0 %v3319_v50  ;;  %1834 = vmatprep.subr.bf16.mxu1 %v3321_v51  ;;  %v3335_v50 = vcombine.high %v171_v41, %v219_v42  ;;  %v3337_v51 = vcombine.high %v172_v45, %v220_v46  ;;  %v226_v30 = vld [vmem:[#allocation5 + $0x268] sm:$0xff] }
  0x58   :  { %1730 = vmatmul.mubr.bf16.vlgmr.msra.gmra.mxu0 %v3218_v55  ;;  %1771 = vmatmul.mubr.bf16.vlgmr.msra.gmra.mxu1 %v3220_v59  ;;  %v3234_v55 = vcombine.low %v73_v36, %v121_v37  ;;  %v3236_v59 = vcombine.low %v74_v38, %v122_v40  ;;  %v81_v36 = vld [vmem:[#allocation2 + $0xe0] sm:$0xff]  ;;  %v82_v38 = vld [vmem:[#allocation2 + $0xe8] sm:$0xff] }
  0x59   :  { %1794 = vmatpush1.bf16.xpose.msra.mxu0 %v3318_v60  ;;  %1835 = vmatpush1.bf16.xpose.msra.mxu1 %v3320_v63  ;;  %v3334_v60 = vcombine.low %v171_v41, %v219_v42  ;;  %v3336_v63 = vcombine.low %v172_v45, %v220_v46  ;;  %v129_v37 = vld [vmem:[#allocation2 + $0x260] sm:$0xff]  ;;  %v130_v40 = vld [vmem:[#allocation2 + $0x268] sm:$0xff]  ;;  %v179_v41 = vld [vmem:[#allocation5 + $0xf0] sm:$0xff] }
  0x5a   :  { %1811 = vmatprep.mubr.bf16.mxu0 %v3223_v0  ;;  %1852 = vmatprep.mubr.bf16.mxu1 %v3225_v1  ;;  %v3239_v0 = vcombine.high %v75_v52, %v123_v53  ;;  %v3241_v1 = vcombine.high %v76_v54, %v124_v56  ;;  %v227_v42 = vld [vmem:[#allocation5 + $0x270] sm:$0xff]  ;;  %v180_v45 = vld [vmem:[#allocation5 + $0xf8] sm:$0xff] }
  0x5b   :  { %1875 = vmatprep.subr.bf16.mxu0 %v3323_v2  ;;  %1916 = vmatprep.subr.bf16.mxu1 %v3325_v3  ;;  %v3339_v2 = vcombine.high %v173_v57, %v221_v58  ;;  %v3341_v3 = vcombine.high %v174_v61, %v222_v62  ;;  %v228_v46 = vld [vmem:[#allocation5 + $0x278] sm:$0xff] }
  0x60   :  { %1812 = vmatmul.mubr.bf16.vlgmr.msra.gmra.mxu0 %v3222_v7  ;;  %1853 = vmatmul.mubr.bf16.vlgmr.msra.gmra.mxu1 %v3224_v11  ;;  %v3238_v7 = vcombine.low %v75_v52, %v123_v53  ;;  %v3240_v11 = vcombine.low %v76_v54, %v124_v56  ;;  %v83_v52 = vld [vmem:[#allocation2 + $0xf0] sm:$0xff]  ;;  %v84_v54 = vld [vmem:[#allocation2 + $0xf8] sm:$0xff] }
  0x61   :  { %1876 = vmatpush1.bf16.xpose.msra.mxu0 %v3322_v12  ;;  %1917 = vmatpush1.bf16.xpose.msra.mxu1 %v3324_v15  ;;  %v3338_v12 = vcombine.low %v173_v57, %v221_v58  ;;  %v3340_v15 = vcombine.low %v174_v61, %v222_v62  ;;  %v131_v53 = vld [vmem:[#allocation2 + $0x270] sm:$0xff]  ;;  %v132_v56 = vld [vmem:[#allocation2 + $0x278] sm:$0xff]  ;;  %v181_v57 = vld [vmem:[#allocation5 + $0x100] sm:$0xff] }
  0x62   :  { %1893 = vmatprep.mubr.bf16.mxu0 %v3227_v16  ;;  %1934 = vmatprep.mubr.bf16.mxu1 %v3229_v17  ;;  %v3243_v16 = vcombine.high %v77_v4, %v125_v5  ;;  %v3245_v17 = vcombine.high %v78_v6, %v126_v8  ;;  %v229_v58 = vld [vmem:[#allocation5 + $0x280] sm:$0xff]  ;;  %v182_v61 = vld [vmem:[#allocation5 + $0x108] sm:$0xff] }
  0x63   :  { %1957 = vmatprep.subr.bf16.mxu0 %v3327_v18  ;;  %1998 = vmatprep.subr.bf16.mxu1 %v3329_v19  ;;  %v3343_v18 = vcombine.high %v175_v9, %v223_v10  ;;  %v3345_v19 = vcombine.high %v176_v13, %v224_v14  ;;  %v230_v62 = vld [vmem:[#allocation5 + $0x288] sm:$0xff] }
  0x68   :  { %1894 = vmatmul.mubr.bf16.vlgmr.msra.gmra.mxu0 %v3226_v23  ;;  %1935 = vmatmul.mubr.bf16.vlgmr.msra.gmra.mxu1 %v3228_v27  ;;  %v3242_v23 = vcombine.low %v77_v4, %v125_v5  ;;  %v3244_v27 = vcombine.low %v78_v6, %v126_v8  ;;  %v85_v4 = vld [vmem:[#allocation2 + $0x100] sm:$0xff]  ;;  %v86_v6 = vld [vmem:[#allocation2 + $0x108] sm:$0xff] }
  0x69   :  { %1958 = vmatpush1.bf16.xpose.msra.mxu0 %v3326_v28  ;;  %1999 = vmatpush1.bf16.xpose.msra.mxu1 %v3328_v31  ;;  %v3342_v28 = vcombine.low %v175_v9, %v223_v10  ;;  %v3344_v31 = vcombine.low %v176_v13, %v224_v14  ;;  %v133_v5 = vld [vmem:[#allocation2 + $0x280] sm:$0xff]  ;;  %v134_v8 = vld [vmem:[#allocation2 + $0x288] sm:$0xff]  ;;  %v183_v9 = vld [vmem:[#allocation5 + $0x110] sm:$0xff] }
  0x6a   :  { %1975 = vmatprep.mubr.bf16.mxu0 %v3231_v32  ;;  %2016 = vmatprep.mubr.bf16.mxu1 %v3233_v33  ;;  %v3247_v32 = vcombine.high %v79_v20, %v127_v21  ;;  %v3249_v33 = vcombine.high %v80_v22, %v128_v24  ;;  %v231_v10 = vld [vmem:[#allocation5 + $0x290] sm:$0xff]  ;;  %v184_v13 = vld [vmem:[#allocation5 + $0x118] sm:$0xff] }
  0x6b   :  { %2039 = vmatprep.subr.bf16.mxu0 %v3331_v34  ;;  %2080 = vmatprep.subr.bf16.mxu1 %v3333_v35  ;;  %v3347_v34 = vcombine.high %v177_v25, %v225_v26  ;;  %v3349_v35 = vcombine.high %v178_v29, %v226_v30  ;;  %v232_v14 = vld [vmem:[#allocation5 + $0x298] sm:$0xff] }
  0x70   :  { %1976 = vmatmul.mubr.bf16.vlgmr.msra.gmra.mxu0 %v3230_v39  ;;  %2017 = vmatmul.mubr.bf16.vlgmr.msra.gmra.mxu1 %v3232_v43  ;;  %v3246_v39 = vcombine.low %v79_v20, %v127_v21  ;;  %v3248_v43 = vcombine.low %v80_v22, %v128_v24  ;;  %v87_v20 = vld [vmem:[#allocation2 + $0x110] sm:$0xff]  ;;  %v88_v22 = vld [vmem:[#allocation2 + $0x118] sm:$0xff] }
  0x71   :  { %2040 = vmatpush1.bf16.xpose.msra.mxu0 %v3330_v44  ;;  %2081 = vmatpush1.bf16.xpose.msra.mxu1 %v3332_v47  ;;  %v3346_v44 = vcombine.low %v177_v25, %v225_v26  ;;  %v3348_v47 = vcombine.low %v178_v29, %v226_v30  ;;  %v135_v21 = vld [vmem:[#allocation2 + $0x290] sm:$0xff]  ;;  %v136_v24 = vld [vmem:[#allocation2 + $0x298] sm:$0xff]  ;;  %v185_v25 = vld [vmem:[#allocation5 + $0x120] sm:$0xff] }
  0x72   :  { %2057 = vmatprep.mubr.bf16.mxu0 %v3235_v48  ;;  %2098 = vmatprep.mubr.bf16.mxu1 %v3237_v49  ;;  %v3251_v48 = vcombine.high %v81_v36, %v129_v37  ;;  %v3253_v49 = vcombine.high %v82_v38, %v130_v40  ;;  %v233_v26 = vld [vmem:[#allocation5 + $0x2a0] sm:$0xff]  ;;  %v186_v29 = vld [vmem:[#allocation5 + $0x128] sm:$0xff] }
  0x73   :  { %2121 = vmatprep.subr.bf16.mxu0 %v3335_v50  ;;  %2162 = vmatprep.subr.bf16.mxu1 %v3337_v51  ;;  %v3351_v50 = vcombine.high %v179_v41, %v227_v42  ;;  %v3353_v51 = vcombine.high %v180_v45, %v228_v46  ;;  %v234_v30 = vld [vmem:[#allocation5 + $0x2a8] sm:$0xff] }
  0x78   :  { %2058 = vmatmul.mubr.bf16.vlgmr.msra.gmra.mxu0 %v3234_v55  ;;  %2099 = vmatmul.mubr.bf16.vlgmr.msra.gmra.mxu1 %v3236_v59  ;;  %v3250_v55 = vcombine.low %v81_v36, %v129_v37  ;;  %v3252_v59 = vcombine.low %v82_v38, %v130_v40  ;;  %v89_v36 = vld [vmem:[#allocation2 + $0x120] sm:$0xff]  ;;  %v90_v38 = vld [vmem:[#allocation2 + $0x128] sm:$0xff] }
  0x79   :  { %2122 = vmatpush1.bf16.xpose.msra.mxu0 %v3334_v60  ;;  %2163 = vmatpush1.bf16.xpose.msra.mxu1 %v3336_v63  ;;  %v3350_v60 = vcombine.low %v179_v41, %v227_v42  ;;  %v3352_v63 = vcombine.low %v180_v45, %v228_v46  ;;  %v137_v37 = vld [vmem:[#allocation2 + $0x2a0] sm:$0xff]  ;;  %v138_v40 = vld [vmem:[#allocation2 + $0x2a8] sm:$0xff]  ;;  %v187_v41 = vld [vmem:[#allocation5 + $0x130] sm:$0xff] }
  0x7a   :  { %2139 = vmatprep.mubr.bf16.mxu0 %v3239_v0  ;;  %2180 = vmatprep.mubr.bf16.mxu1 %v3241_v1  ;;  %v3255_v0 = vcombine.high %v83_v52, %v131_v53  ;;  %v3257_v1 = vcombine.high %v84_v54, %v132_v56  ;;  %v235_v42 = vld [vmem:[#allocation5 + $0x2b0] sm:$0xff]  ;;  %v188_v45 = vld [vmem:[#allocation5 + $0x138] sm:$0xff] }
  0x7b   :  { %2203 = vmatprep.subr.bf16.mxu0 %v3339_v2  ;;  %2244 = vmatprep.subr.bf16.mxu1 %v3341_v3  ;;  %v3355_v2 = vcombine.high %v181_v57, %v229_v58  ;;  %v3357_v3 = vcombine.high %v182_v61, %v230_v62  ;;  %v236_v46 = vld [vmem:[#allocation5 + $0x2b8] sm:$0xff] }
  0x80   :  { %2140 = vmatmul.mubr.bf16.vlgmr.msra.gmra.mxu0 %v3238_v7  ;;  %2181 = vmatmul.mubr.bf16.vlgmr.msra.gmra.mxu1 %v3240_v11  ;;  %v3254_v7 = vcombine.low %v83_v52, %v131_v53  ;;  %v3256_v11 = vcombine.low %v84_v54, %v132_v56  ;;  %v91_v52 = vld [vmem:[#allocation2 + $0x130] sm:$0xff]  ;;  %v92_v54 = vld [vmem:[#allocation2 + $0x138] sm:$0xff] }
  0x81   :  { %2204 = vmatpush1.bf16.xpose.msra.mxu0 %v3338_v12  ;;  %2245 = vmatpush1.bf16.xpose.msra.mxu1 %v3340_v15  ;;  %v3354_v12 = vcombine.low %v181_v57, %v229_v58  ;;  %v3356_v15 = vcombine.low %v182_v61, %v230_v62  ;;  %v139_v53 = vld [vmem:[#allocation2 + $0x2b0] sm:$0xff]  ;;  %v140_v56 = vld [vmem:[#allocation2 + $0x2b8] sm:$0xff]  ;;  %v189_v57 = vld [vmem:[#allocation5 + $0x140] sm:$0xff] }
  0x82   :  { %2221 = vmatprep.mubr.bf16.mxu0 %v3243_v16  ;;  %2262 = vmatprep.mubr.bf16.mxu1 %v3245_v17  ;;  %v3259_v16 = vcombine.high %v85_v4, %v133_v5  ;;  %v3261_v17 = vcombine.high %v86_v6, %v134_v8  ;;  %v237_v58 = vld [vmem:[#allocation5 + $0x2c0] sm:$0xff]  ;;  %v190_v61 = vld [vmem:[#allocation5 + $0x148] sm:$0xff] }
  0x83   :  { %2285 = vmatprep.subr.bf16.mxu0 %v3343_v18  ;;  %2326 = vmatprep.subr.bf16.mxu1 %v3345_v19  ;;  %v3359_v18 = vcombine.high %v183_v9, %v231_v10  ;;  %v3361_v19 = vcombine.high %v184_v13, %v232_v14  ;;  %v238_v62 = vld [vmem:[#allocation5 + $0x2c8] sm:$0xff] }
  0x88   :  { %2222 = vmatmul.mubr.bf16.vlgmr.msra.gmra.mxu0 %v3242_v23  ;;  %2263 = vmatmul.mubr.bf16.vlgmr.msra.gmra.mxu1 %v3244_v27  ;;  %v3258_v23 = vcombine.low %v85_v4, %v133_v5  ;;  %v3260_v27 = vcombine.low %v86_v6, %v134_v8  ;;  %v93_v4 = vld [vmem:[#allocation2 + $0x140] sm:$0xff]  ;;  %v94_v6 = vld [vmem:[#allocation2 + $0x148] sm:$0xff] }
  0x89   :  { %2286 = vmatpush1.bf16.xpose.msra.mxu0 %v3342_v28  ;;  %2327 = vmatpush1.bf16.xpose.msra.mxu1 %v3344_v31  ;;  %v3358_v28 = vcombine.low %v183_v9, %v231_v10  ;;  %v3360_v31 = vcombine.low %v184_v13, %v232_v14  ;;  %v141_v5 = vld [vmem:[#allocation2 + $0x2c0] sm:$0xff]  ;;  %v142_v8 = vld [vmem:[#allocation2 + $0x2c8] sm:$0xff]  ;;  %v191_v9 = vld [vmem:[#allocation5 + $0x150] sm:$0xff] }
  0x8a   :  { %2303 = vmatprep.mubr.bf16.mxu0 %v3247_v32  ;;  %2344 = vmatprep.mubr.bf16.mxu1 %v3249_v33  ;;  %v3263_v32 = vcombine.high %v87_v20, %v135_v21  ;;  %v3265_v33 = vcombine.high %v88_v22, %v136_v24  ;;  %v239_v10 = vld [vmem:[#allocation5 + $0x2d0] sm:$0xff]  ;;  %v192_v13 = vld [vmem:[#allocation5 + $0x158] sm:$0xff] }
  0x8b   :  { %2367 = vmatprep.subr.bf16.mxu0 %v3347_v34  ;;  %2408 = vmatprep.subr.bf16.mxu1 %v3349_v35  ;;  %v3363_v34 = vcombine.high %v185_v25, %v233_v26  ;;  %v3365_v35 = vcombine.high %v186_v29, %v234_v30  ;;  %v240_v14 = vld [vmem:[#allocation5 + $0x2d8] sm:$0xff] }
  0x90   :  { %2304 = vmatmul.mubr.bf16.vlgmr.msra.gmra.mxu0 %v3246_v39  ;;  %2345 = vmatmul.mubr.bf16.vlgmr.msra.gmra.mxu1 %v3248_v43  ;;  %v3262_v39 = vcombine.low %v87_v20, %v135_v21  ;;  %v3264_v43 = vcombine.low %v88_v22, %v136_v24  ;;  %v95_v20 = vld [vmem:[#allocation2 + $0x150] sm:$0xff]  ;;  %v96_v22 = vld [vmem:[#allocation2 + $0x158] sm:$0xff] }
  0x91   :  { %2368 = vmatpush1.bf16.xpose.msra.mxu0 %v3346_v44  ;;  %2409 = vmatpush1.bf16.xpose.msra.mxu1 %v3348_v47  ;;  %v3362_v44 = vcombine.low %v185_v25, %v233_v26  ;;  %v3364_v47 = vcombine.low %v186_v29, %v234_v30  ;;  %v143_v21 = vld [vmem:[#allocation2 + $0x2d0] sm:$0xff]  ;;  %v144_v24 = vld [vmem:[#allocation2 + $0x2d8] sm:$0xff]  ;;  %v193_v25 = vld [vmem:[#allocation5 + $0x160] sm:$0xff] }
  0x92   :  { %2385 = vmatprep.mubr.bf16.mxu0 %v3251_v48  ;;  %2426 = vmatprep.mubr.bf16.mxu1 %v3253_v49  ;;  %v3267_v48 = vcombine.high %v89_v36, %v137_v37  ;;  %v3269_v49 = vcombine.high %v90_v38, %v138_v40  ;;  %v241_v26 = vld [vmem:[#allocation5 + $0x2e0] sm:$0xff]  ;;  %v194_v29 = vld [vmem:[#allocation5 + $0x168] sm:$0xff] }
  0x93   :  { %2449 = vmatprep.subr.bf16.mxu0 %v3351_v50  ;;  %2490 = vmatprep.subr.bf16.mxu1 %v3353_v51  ;;  %v3367_v50 = vcombine.high %v187_v41, %v235_v42  ;;  %v3369_v51 = vcombine.high %v188_v45, %v236_v46  ;;  %v242_v30 = vld [vmem:[#allocation5 + $0x2e8] sm:$0xff] }
  0x98   :  { %2386 = vmatmul.mubr.bf16.vlgmr.msra.gmra.mxu0 %v3250_v55  ;;  %2427 = vmatmul.mubr.bf16.vlgmr.msra.gmra.mxu1 %v3252_v59  ;;  %v3266_v55 = vcombine.low %v89_v36, %v137_v37  ;;  %v3268_v59 = vcombine.low %v90_v38, %v138_v40  ;;  %v97_v36 = vld [vmem:[#allocation2 + $0x160] sm:$0xff]  ;;  %v98_v38 = vld [vmem:[#allocation2 + $0x168] sm:$0xff] }
  0x99   :  { %2450 = vmatpush1.bf16.xpose.msra.mxu0 %v3350_v60  ;;  %2491 = vmatpush1.bf16.xpose.msra.mxu1 %v3352_v63  ;;  %v3366_v60 = vcombine.low %v187_v41, %v235_v42  ;;  %v3368_v63 = vcombine.low %v188_v45, %v236_v46  ;;  %v145_v37 = vld [vmem:[#allocation2 + $0x2e0] sm:$0xff]  ;;  %v146_v40 = vld [vmem:[#allocation2 + $0x2e8] sm:$0xff]  ;;  %v195_v41 = vld [vmem:[#allocation5 + $0x170] sm:$0xff] }
  0x9a   :  { %2467 = vmatprep.mubr.bf16.mxu0 %v3255_v0  ;;  %2508 = vmatprep.mubr.bf16.mxu1 %v3257_v1  ;;  %v3271_v0 = vcombine.high %v91_v52, %v139_v53  ;;  %v3273_v1 = vcombine.high %v92_v54, %v140_v56  ;;  %v243_v42 = vld [vmem:[#allocation5 + $0x2f0] sm:$0xff]  ;;  %v196_v45 = vld [vmem:[#allocation5 + $0x178] sm:$0xff] }
  0x9b   :  { %2531 = vmatprep.subr.bf16.mxu0 %v3355_v2  ;;  %2572 = vmatprep.subr.bf16.mxu1 %v3357_v3  ;;  %v3371_v2 = vcombine.high %v189_v57, %v237_v58  ;;  %v3373_v3 = vcombine.high %v190_v61, %v238_v62  ;;  %v244_v46 = vld [vmem:[#allocation5 + $0x2f8] sm:$0xff] }
  0xa0   :  { %2468 = vmatmul.mubr.bf16.vlgmr.msra.gmra.mxu0 %v3254_v7  ;;  %2509 = vmatmul.mubr.bf16.vlgmr.msra.gmra.mxu1 %v3256_v11  ;;  %v3270_v7 = vcombine.low %v91_v52, %v139_v53  ;;  %v3272_v11 = vcombine.low %v92_v54, %v140_v56  ;;  %v99_v52 = vld [vmem:[#allocation2 + $0x170] sm:$0xff]  ;;  %v3282_v54 = vcombine.low %v97_v36, %v145_v37  ;;  %v148_v56 = vld [vmem:[#allocation2 + $0x2f8] sm:$0xff] }
  0xa1   :  { %2532 = vmatpush1.bf16.xpose.msra.mxu0 %v3354_v12  ;;  %2573 = vmatpush1.bf16.xpose.msra.mxu1 %v3356_v15  ;;  %v3370_v12 = vcombine.low %v189_v57, %v237_v58  ;;  %v3372_v15 = vcombine.low %v190_v61, %v238_v62  ;;  %v147_v53 = vld [vmem:[#allocation2 + $0x2f0] sm:$0xff]  ;;  %v3284_v57 = vcombine.low %v98_v38, %v146_v40 }
  0xa2   :  { %2549 = vmatprep.mubr.bf16.mxu0 %v3259_v16  ;;  %2590 = vmatprep.mubr.bf16.mxu1 %v3261_v17  ;;  %v3275_v16 = vcombine.high %v93_v4, %v141_v5  ;;  %v3277_v17 = vcombine.high %v94_v6, %v142_v8  ;;  %v3382_v58 = vcombine.low %v195_v41, %v243_v42 }
  0xa3   :  { %2613 = vmatprep.subr.bf16.mxu0 %v3359_v18  ;;  %2654 = vmatprep.subr.bf16.mxu1 %v3361_v19  ;;  %v3375_v18 = vcombine.high %v191_v9, %v239_v10  ;;  %v3377_v19 = vcombine.high %v192_v13, %v240_v14  ;;  %v3286_v62 = vcombine.low %v99_v52, %v147_v53 }
  0xa8   :  { %2550 = vmatmul.mubr.bf16.vlgmr.msra.gmra.mxu0 %v3258_v23  ;;  %2591 = vmatmul.mubr.bf16.vlgmr.msra.gmra.mxu1 %v3260_v27  ;;  %v3274_v23 = vcombine.low %v93_v4, %v141_v5  ;;  %v3276_v27 = vcombine.low %v94_v6, %v142_v8 }
  0xa9   :  { %2614 = vmatpush1.bf16.xpose.msra.mxu0 %v3358_v28  ;;  %2655 = vmatpush1.bf16.xpose.msra.mxu1 %v3360_v31  ;;  %v3374_v28 = vcombine.low %v191_v9, %v239_v10  ;;  %v3376_v31 = vcombine.low %v192_v13, %v240_v14 }
  0xaa   :  { %2631 = vmatprep.mubr.bf16.mxu0 %v3263_v32  ;;  %2672 = vmatprep.mubr.bf16.mxu1 %v3265_v33  ;;  %v3279_v32 = vcombine.high %v95_v20, %v143_v21  ;;  %v3281_v33 = vcombine.high %v96_v22, %v144_v24 }
  0xab   :  { %2695 = vmatprep.subr.bf16.mxu0 %v3363_v34  ;;  %2736 = vmatprep.subr.bf16.mxu1 %v3365_v35  ;;  %v3379_v34 = vcombine.high %v193_v25, %v241_v26  ;;  %v3381_v35 = vcombine.high %v194_v29, %v242_v30 }
  0xb0   :  { %2632 = vmatmul.mubr.bf16.vlgmr.msra.gmra.mxu0 %v3262_v39  ;;  %2673 = vmatmul.mubr.bf16.vlgmr.msra.gmra.mxu1 %v3264_v43  ;;  %v3278_v39 = vcombine.low %v95_v20, %v143_v21  ;;  %v3280_v43 = vcombine.low %v96_v22, %v144_v24 }
  0xb1   :  { %2696 = vmatpush1.bf16.xpose.msra.mxu0 %v3362_v44  ;;  %2737 = vmatpush1.bf16.xpose.msra.mxu1 %v3364_v47  ;;  %v3378_v44 = vcombine.low %v193_v25, %v241_v26  ;;  %v3380_v47 = vcombine.low %v194_v29, %v242_v30 }
  0xb2   :  { %2713 = vmatprep.mubr.bf16.mxu0 %v3267_v48  ;;  %2754 = vmatprep.mubr.bf16.mxu1 %v3269_v49  ;;  %v3283_v48 = vcombine.high %v97_v36, %v145_v37  ;;  %v3285_v49 = vcombine.high %v98_v38, %v146_v40 }
  0xb3   :  { %2777 = vmatprep.subr.bf16.mxu0 %v3367_v50  ;;  %2818 = vmatprep.subr.bf16.mxu1 %v3369_v51  ;;  %v3383_v50 = vcombine.high %v195_v41, %v243_v42  ;;  %v3385_v51 = vcombine.high %v196_v45, %v244_v46 }
  0xb8   :  { %2714 = vmatmul.mubr.bf16.vlgmr.msra.gmra.mxu0 %v3266_v55  ;;  %2755 = vmatmul.mubr.bf16.vlgmr.msra.gmra.mxu1 %v3268_v59  ;;  %v100_v55 = vld [vmem:[#allocation2 + $0x178] sm:$0xff]  ;;  %v3384_v59 = vcombine.low %v196_v45, %v244_v46 }
  0xb9   :  { %2778 = vmatpush1.bf16.xpose.msra.mxu0 %v3366_v60  ;;  %2819 = vmatpush1.bf16.xpose.msra.mxu1 %v3368_v63  ;;  %v3287_v60 = vcombine.high %v99_v52, %v147_v53  ;;  %v3289_v61 = vcombine.high %v100_v55, %v148_v56  ;;  %v3288_v63 = vcombine.low %v100_v55, %v148_v56 }
  0xba   :  { %2795 = vmatprep.mubr.bf16.mxu0 %v3271_v0  ;;  %2836 = vmatprep.mubr.bf16.mxu1 %v3273_v1 }
  0xbb   :  { %2859 = vmatprep.subr.bf16.mxu0 %v3371_v2  ;;  %2900 = vmatprep.subr.bf16.mxu1 %v3373_v3 }
  0xc0   :  { %2796 = vmatmul.mubr.bf16.vlgmr.msra.gmra.mxu0 %v3270_v7  ;;  %2837 = vmatmul.mubr.bf16.vlgmr.msra.gmra.mxu1 %v3272_v11 }
  0xc1   :  { %2860 = vmatpush1.bf16.xpose.msra.mxu0 %v3370_v12  ;;  %2901 = vmatpush1.bf16.xpose.msra.mxu1 %v3372_v15 }
  0xc2   :  { %2877 = vmatprep.mubr.bf16.mxu0 %v3275_v16  ;;  %2918 = vmatprep.mubr.bf16.mxu1 %v3277_v17 }
  0xc3   :  { %2941 = vmatprep.subr.bf16.mxu0 %v3375_v18  ;;  %2982 = vmatprep.subr.bf16.mxu1 %v3377_v19 }
  0xc8   :  { %2878 = vmatmul.mubr.bf16.vlgmr.msra.gmra.mxu0 %v3274_v23  ;;  %2919 = vmatmul.mubr.bf16.vlgmr.msra.gmra.mxu1 %v3276_v27 }
  0xc9   :  { %2942 = vmatpush1.bf16.xpose.msra.mxu0 %v3374_v28  ;;  %2983 = vmatpush1.bf16.xpose.msra.mxu1 %v3376_v31 }
  0xca   :  { %2959 = vmatprep.mubr.bf16.mxu0 %v3279_v32  ;;  %3000 = vmatprep.mubr.bf16.mxu1 %v3281_v33 }
  0xcb   :  { %3023 = vmatprep.subr.bf16.mxu0 %v3379_v34  ;;  %3064 = vmatprep.subr.bf16.mxu1 %v3381_v35 }
  0xd0   :  { %2960 = vmatmul.mubr.bf16.vlgmr.msra.gmra.mxu0 %v3278_v39  ;;  %3001 = vmatmul.mubr.bf16.vlgmr.msra.gmra.mxu1 %v3280_v43 }
  0xd1   :  { %3024 = vmatpush1.bf16.xpose.msra.mxu0 %v3378_v44  ;;  %3065 = vmatpush1.bf16.xpose.msra.mxu1 %v3380_v47 }
  0xd2   :  { %3041 = vmatprep.mubr.bf16.mxu0 %v3283_v48  ;;  %3082 = vmatprep.mubr.bf16.mxu1 %v3285_v49 }
  0xd3   :  { %3105 = vmatprep.subr.bf16.mxu0 %v3383_v50  ;;  %3146 = vmatprep.subr.bf16.mxu1 %v3385_v51 }
  0xd8   :  { %3042 = vmatmul.mubr.bf16.vlgmr.msra.gmra.mxu0 %v3282_v54  ;;  %3083 = vmatmul.mubr.bf16.vlgmr.msra.gmra.mxu1 %v3284_v57 }
  0xd9   :  { %3106 = vmatpush1.bf16.xpose.msra.mxu0 %v3382_v58  ;;  %3147 = vmatpush1.bf16.xpose.msra.mxu1 %v3384_v59 }
  0xda   :  { %3123 = vmatprep.mubr.bf16.mxu0 %v3287_v60  ;;  %3164 = vmatprep.mubr.bf16.mxu1 %v3289_v61 }
  0xe0   :  { %3124 = vmatmul.mubr.bf16.vlgmr.msra.gmra.mxu0 %v3286_v62  ;;  %3165 = vmatmul.mubr.bf16.vlgmr.msra.gmra.mxu1 %v3288_v63 }
  0xe8   :  { %v1239_v0 = vpop.f32.mrf.mxu0  ;;  %v1280_v1 = vpop.f32.mrf.mxu1 }
  0xe9   :  { %v1281_v2 = vadd.f32 %v1280_v1, %v1239_v0 }
  0xea   :  { %v1241_v3 = vpop.f32.mrf.mxu0  ;;  %v1282_v4 = vpop.f32.mrf.mxu1 }
  0xec   :  { %v1242_v5 = vpop.f32.mrf.mxu0  ;;  %v1283_v6 = vpop.f32.mrf.mxu1 }
  0xed   :  { %v1284_v7 = vadd.f32 %v1283_v6, %v1242_v5 }
  0xee   :  { %v1244_v8 = vpop.f32.mrf.mxu0  ;;  %v1285_v9 = vpop.f32.mrf.mxu1 }
  0xf0   :  { %v1321_v10 = vpop.f32.mrf.mxu0  ;;  %v1362_v12 = vpop.f32.mrf.mxu1 }
  0xf1   :  { %v1322_v11 = vadd.f32 %v1321_v10, %v1281_v2 }
  0xf2   :  { %v1323_v13 = vpop.f32.mrf.mxu0  ;;  %v1364_v15 = vpop.f32.mrf.mxu1 }
  0xf3   :  { %v1363_v14 = vadd.f32 %v1362_v12, %v1322_v11 }
  0xf4   :  { %v1324_v16 = vpop.f32.mrf.mxu0  ;;  %v1365_v18 = vpop.f32.mrf.mxu1 }
  0xf5   :  { %v1325_v17 = vadd.f32 %v1324_v16, %v1284_v7 }
  0xf6   :  { %v1326_v19 = vpop.f32.mrf.mxu0  ;;  %v1367_v21 = vpop.f32.mrf.mxu1 }
  0xf7   :  { %v1366_v20 = vadd.f32 %v1365_v18, %v1325_v17 }
  0xf8   :  { %v1403_v22 = vpop.f32.mrf.mxu0  ;;  %v1444_v24 = vpop.f32.mrf.mxu1 }
  0xf9   :  { %v1404_v23 = vadd.f32 %v1403_v22, %v1363_v14 }
  0xfa   :  { %v1405_v25 = vpop.f32.mrf.mxu0  ;;  %v1446_v27 = vpop.f32.mrf.mxu1 }
  0xfb   :  { %v1445_v26 = vadd.f32 %v1444_v24, %v1404_v23 }
  0xfc   :  { %v1406_v28 = vpop.f32.mrf.mxu0  ;;  %v1447_v30 = vpop.f32.mrf.mxu1 }
  0xfd   :  { %v1407_v29 = vadd.f32 %v1406_v28, %v1366_v20 }
  0xfe   :  { %v1408_v31 = vpop.f32.mrf.mxu0  ;;  %v1449_v33 = vpop.f32.mrf.mxu1 }
  0xff   :  { %v1448_v32 = vadd.f32 %v1447_v30, %v1407_v29 }
 0x100   :  { %v1485_v34 = vpop.f32.mrf.mxu0  ;;  %v1526_v36 = vpop.f32.mrf.mxu1 }
 0x101   :  { %v1486_v35 = vadd.f32 %v1485_v34, %v1445_v26 }
 0x102   :  { %v1487_v37 = vpop.f32.mrf.mxu0  ;;  %v1528_v39 = vpop.f32.mrf.mxu1 }
 0x103   :  { %v1527_v38 = vadd.f32 %v1526_v36, %v1486_v35 }
 0x104   :  { %v1488_v40 = vpop.f32.mrf.mxu0  ;;  %v1529_v42 = vpop.f32.mrf.mxu1 }
 0x105   :  { %v1489_v41 = vadd.f32 %v1488_v40, %v1448_v32 }
 0x106   :  { %v1490_v43 = vpop.f32.mrf.mxu0  ;;  %v1531_v45 = vpop.f32.mrf.mxu1 }
 0x107   :  { %v1530_v44 = vadd.f32 %v1529_v42, %v1489_v41 }
 0x108   :  { %v1567_v46 = vpop.f32.mrf.mxu0  ;;  %v1608_v48 = vpop.f32.mrf.mxu1 }
 0x109   :  { %v1568_v47 = vadd.f32 %v1567_v46, %v1527_v38 }
 0x10a   :  { %v1569_v49 = vpop.f32.mrf.mxu0  ;;  %v1610_v51 = vpop.f32.mrf.mxu1 }
 0x10b   :  { %v1609_v50 = vadd.f32 %v1608_v48, %v1568_v47 }
 0x10c   :  { %v1570_v52 = vpop.f32.mrf.mxu0  ;;  %v1611_v54 = vpop.f32.mrf.mxu1 }
 0x10d   :  { %v1571_v53 = vadd.f32 %v1570_v52, %v1530_v44 }
 0x10e   :  { %v1572_v55 = vpop.f32.mrf.mxu0  ;;  %v1613_v57 = vpop.f32.mrf.mxu1 }
 0x10f   :  { %v1612_v56 = vadd.f32 %v1611_v54, %v1571_v53 }
 0x110   :  { %v1649_v58 = vpop.f32.mrf.mxu0  ;;  %v1690_v60 = vpop.f32.mrf.mxu1 }
 0x111   :  { %v1650_v59 = vadd.f32 %v1649_v58, %v1609_v50 }
 0x112   :  { %v1651_v61 = vpop.f32.mrf.mxu0  ;;  %v1692_v63 = vpop.f32.mrf.mxu1 }
 0x113   :  { %v1691_v62 = vadd.f32 %v1690_v60, %v1650_v59 }
 0x114   :  { %v1652_v0 = vpop.f32.mrf.mxu0  ;;  %v1693_v2 = vpop.f32.mrf.mxu1 }
 0x115   :  { %v1653_v1 = vadd.f32 %v1652_v0, %v1612_v56 }
 0x116   :  { %v1654_v3 = vpop.f32.mrf.mxu0  ;;  %v1695_v5 = vpop.f32.mrf.mxu1 }
 0x117   :  { %v1694_v4 = vadd.f32 %v1693_v2, %v1653_v1 }
 0x118   :  { %v1731_v6 = vpop.f32.mrf.mxu0  ;;  %v1772_v8 = vpop.f32.mrf.mxu1 }
 0x119   :  { %v1732_v7 = vadd.f32 %v1731_v6, %v1691_v62 }
 0x11a   :  { %v1733_v9 = vpop.f32.mrf.mxu0  ;;  %v1774_v11 = vpop.f32.mrf.mxu1 }
 0x11b   :  { %v1773_v10 = vadd.f32 %v1772_v8, %v1732_v7 }
 0x11c   :  { %v1734_v12 = vpop.f32.mrf.mxu0  ;;  %v1775_v14 = vpop.f32.mrf.mxu1 }
 0x11d   :  { %v1735_v13 = vadd.f32 %v1734_v12, %v1694_v4 }
 0x11e   :  { %v1736_v15 = vpop.f32.mrf.mxu0  ;;  %v1777_v17 = vpop.f32.mrf.mxu1 }
 0x11f   :  { %v1776_v16 = vadd.f32 %v1775_v14, %v1735_v13 }
 0x120   :  { %v1813_v18 = vpop.f32.mrf.mxu0  ;;  %v1854_v20 = vpop.f32.mrf.mxu1 }
 0x121   :  { %v1814_v19 = vadd.f32 %v1813_v18, %v1773_v10 }
 0x122   :  { %v1815_v21 = vpop.f32.mrf.mxu0  ;;  %v1856_v23 = vpop.f32.mrf.mxu1 }
 0x123   :  { %v1855_v22 = vadd.f32 %v1854_v20, %v1814_v19 }
 0x124   :  { %v1816_v24 = vpop.f32.mrf.mxu0  ;;  %v1857_v26 = vpop.f32.mrf.mxu1 }
 0x125   :  { %v1817_v25 = vadd.f32 %v1816_v24, %v1776_v16 }
 0x126   :  { %v1818_v27 = vpop.f32.mrf.mxu0  ;;  %v1859_v29 = vpop.f32.mrf.mxu1 }
 0x127   :  { %v1858_v28 = vadd.f32 %v1857_v26, %v1817_v25 }
 0x128   :  { %v1895_v30 = vpop.f32.mrf.mxu0  ;;  %v1936_v31 = vpop.f32.mrf.mxu1 }
 0x129   :  { %v1896_v61 = vadd.f32 %v1895_v30, %v1855_v22 }
 0x12a   :  { %v1897_v32 = vpop.f32.mrf.mxu0  ;;  %v1938_v33 = vpop.f32.mrf.mxu1 }
 0x12b   :  { %v1937_v2 = vadd.f32 %v1936_v31, %v1896_v61 }
 0x12c   :  { %v1898_v34 = vpop.f32.mrf.mxu0  ;;  %v1939_v35 = vpop.f32.mrf.mxu1 }
 0x12d   :  { %v1899_v3 = vadd.f32 %v1898_v34, %v1858_v28 }
 0x12e   :  { %v1900_v36 = vpop.f32.mrf.mxu0  ;;  %v1941_v37 = vpop.f32.mrf.mxu1 }
 0x12f   :  { %v1940_v9 = vadd.f32 %v1939_v35, %v1899_v3 }
 0x130   :  { %v1977_v38 = vpop.f32.mrf.mxu0  ;;  %v2018_v39 = vpop.f32.mrf.mxu1 }
 0x131   :  { %v1978_v6 = vadd.f32 %v1977_v38, %v1937_v2 }
 0x132   :  { %v1979_v40 = vpop.f32.mrf.mxu0  ;;  %v2020_v41 = vpop.f32.mrf.mxu1 }
 0x133   :  { %v2019_v12 = vadd.f32 %v2018_v39, %v1978_v6 }
 0x134   :  { %v1980_v42 = vpop.f32.mrf.mxu0  ;;  %v2021_v43 = vpop.f32.mrf.mxu1 }
 0x135   :  { %v1981_v13 = vadd.f32 %v1980_v42, %v1940_v9 }
 0x136   :  { %v1982_v44 = vpop.f32.mrf.mxu0  ;;  %v2023_v45 = vpop.f32.mrf.mxu1 }
 0x137   :  { %v2022_v19 = vadd.f32 %v2021_v43, %v1981_v13 }
 0x138   :  { %v2059_v46 = vpop.f32.mrf.mxu0  ;;  %v2100_v47 = vpop.f32.mrf.mxu1 }
 0x139   :  { %v2060_v16 = vadd.f32 %v2059_v46, %v2019_v12 }
 0x13a   :  { %v2061_v48 = vpop.f32.mrf.mxu0  ;;  %v2102_v49 = vpop.f32.mrf.mxu1 }
 0x13b   :  { %v2101_v22 = vadd.f32 %v2100_v47, %v2060_v16 }
 0x13c   :  { %v2062_v50 = vpop.f32.mrf.mxu0  ;;  %v2103_v51 = vpop.f32.mrf.mxu1 }
 0x13d   :  { %v2063_v23 = vadd.f32 %v2062_v50, %v2022_v19 }
 0x13e   :  { %v2064_v52 = vpop.f32.mrf.mxu0  ;;  %v2105_v53 = vpop.f32.mrf.mxu1 }
 0x13f   :  { %v2104_v29 = vadd.f32 %v2103_v51, %v2063_v23 }
 0x140   :  { %v2141_v54 = vpop.f32.mrf.mxu0  ;;  %v2182_v55 = vpop.f32.mrf.mxu1 }
 0x141   :  { %v2142_v26 = vadd.f32 %v2141_v54, %v2101_v22 }
 0x142   :  { %v2143_v56 = vpop.f32.mrf.mxu0  ;;  %v2184_v57 = vpop.f32.mrf.mxu1 }
 0x143   :  { %v2183_v32 = vadd.f32 %v2182_v55, %v2142_v26 }
 0x144   :  { %v2144_v58 = vpop.f32.mrf.mxu0  ;;  %v2185_v59 = vpop.f32.mrf.mxu1 }
 0x145   :  { %v2145_v33 = vadd.f32 %v2144_v58, %v2104_v29 }
 0x146   :  { %v2146_v60 = vpop.f32.mrf.mxu0  ;;  %v2187_v62 = vpop.f32.mrf.mxu1 }
 0x147   :  { %v2186_v39 = vadd.f32 %v2185_v59, %v2145_v33 }
 0x148   :  { %v2223_v63 = vpop.f32.mrf.mxu0  ;;  %v2264_v0 = vpop.f32.mrf.mxu1 }
 0x149   :  { %v2224_v36 = vadd.f32 %v2223_v63, %v2183_v32 }
 0x14a   :  { %v2225_v1 = vpop.f32.mrf.mxu0  ;;  %v2266_v4 = vpop.f32.mrf.mxu1 }
 0x14b   :  { %v2265_v42 = vadd.f32 %v2264_v0, %v2224_v36 }
 0x14c   :  { %v2226_v5 = vpop.f32.mrf.mxu0  ;;  %v2267_v7 = vpop.f32.mrf.mxu1 }
 0x14d   :  { %v2227_v43 = vadd.f32 %v2226_v5, %v2186_v39 }
 0x14e   :  { %v2228_v8 = vpop.f32.mrf.mxu0  ;;  %v2269_v10 = vpop.f32.mrf.mxu1 }
 0x14f   :  { %v2268_v49 = vadd.f32 %v2267_v7, %v2227_v43 }
 0x150   :  { %v2305_v11 = vpop.f32.mrf.mxu0  ;;  %v2346_v14 = vpop.f32.mrf.mxu1 }
 0x151   :  { %v2306_v46 = vadd.f32 %v2305_v11, %v2265_v42 }
 0x152   :  { %v2307_v15 = vpop.f32.mrf.mxu0  ;;  %v2348_v17 = vpop.f32.mrf.mxu1 }
 0x153   :  { %v2347_v52 = vadd.f32 %v2346_v14, %v2306_v46 }
 0x154   :  { %v2308_v18 = vpop.f32.mrf.mxu0  ;;  %v2349_v20 = vpop.f32.mrf.mxu1 }
 0x155   :  { %v2309_v53 = vadd.f32 %v2308_v18, %v2268_v49 }
 0x156   :  { %v2310_v21 = vpop.f32.mrf.mxu0  ;;  %v2351_v24 = vpop.f32.mrf.mxu1 }
 0x157   :  { %v2350_v59 = vadd.f32 %v2349_v20, %v2309_v53 }
 0x158   :  { %v2387_v25 = vpop.f32.mrf.mxu0  ;;  %v2428_v27 = vpop.f32.mrf.mxu1 }
 0x159   :  { %v2388_v56 = vadd.f32 %v2387_v25, %v2347_v52 }
 0x15a   :  { %v2389_v28 = vpop.f32.mrf.mxu0  ;;  %v2430_v30 = vpop.f32.mrf.mxu1 }
 0x15b   :  { %v2429_v62 = vadd.f32 %v2428_v27, %v2388_v56 }
 0x15c   :  { %v2390_v31 = vpop.f32.mrf.mxu0  ;;  %v2431_v34 = vpop.f32.mrf.mxu1 }
 0x15d   :  { %v2391_v63 = vadd.f32 %v2390_v31, %v2350_v59 }
 0x15e   :  { %v2392_v35 = vpop.f32.mrf.mxu0  ;;  %v2433_v37 = vpop.f32.mrf.mxu1 }
 0x15f   :  { %v2432_v5 = vadd.f32 %v2431_v34, %v2391_v63 }
 0x160   :  { %v2469_v38 = vpop.f32.mrf.mxu0  ;;  %v2510_v40 = vpop.f32.mrf.mxu1 }
 0x161   :  { %v2470_v2 = vadd.f32 %v2469_v38, %v2429_v62 }
 0x162   :  { %v2471_v41 = vpop.f32.mrf.mxu0  ;;  %v2512_v44 = vpop.f32.mrf.mxu1 }
 0x163   :  { %v2511_v8 = vadd.f32 %v2510_v40, %v2470_v2 }
 0x164   :  { %v2472_v45 = vpop.f32.mrf.mxu0  ;;  %v2513_v47 = vpop.f32.mrf.mxu1 }
 0x165   :  { %v2473_v9 = vadd.f32 %v2472_v45, %v2432_v5 }
 0x166   :  { %v2474_v48 = vpop.f32.mrf.mxu0  ;;  %v2515_v50 = vpop.f32.mrf.mxu1 }
 0x167   :  { %v2514_v15 = vadd.f32 %v2513_v47, %v2473_v9 }
 0x168   :  { %v2551_v51 = vpop.f32.mrf.mxu0  ;;  %v2592_v54 = vpop.f32.mrf.mxu1 }
 0x169   :  { %v2552_v12 = vadd.f32 %v2551_v51, %v2511_v8 }
 0x16a   :  { %v2553_v55 = vpop.f32.mrf.mxu0  ;;  %v2594_v57 = vpop.f32.mrf.mxu1 }
 0x16b   :  { %v2593_v18 = vadd.f32 %v2592_v54, %v2552_v12 }
 0x16c   :  { %v2554_v58 = vpop.f32.mrf.mxu0  ;;  %v2595_v60 = vpop.f32.mrf.mxu1 }
 0x16d   :  { %v2555_v19 = vadd.f32 %v2554_v58, %v2514_v15 }
 0x16e   :  { %v2556_v61 = vpop.f32.mrf.mxu0  ;;  %v2597_v0 = vpop.f32.mrf.mxu1 }
 0x16f   :  { %v2596_v25 = vadd.f32 %v2595_v60, %v2555_v19 }
 0x170   :  { %v2633_v1 = vpop.f32.mrf.mxu0  ;;  %v2674_v3 = vpop.f32.mrf.mxu1 }
 0x171   :  { %v2634_v22 = vadd.f32 %v2633_v1, %v2593_v18 }
 0x172   :  { %v2635_v4 = vpop.f32.mrf.mxu0  ;;  %v2676_v6 = vpop.f32.mrf.mxu1 }
 0x173   :  { %v2675_v28 = vadd.f32 %v2674_v3, %v2634_v22 }
 0x174   :  { %v2636_v7 = vpop.f32.mrf.mxu0  ;;  %v2677_v10 = vpop.f32.mrf.mxu1 }
 0x175   :  { %v2637_v29 = vadd.f32 %v2636_v7, %v2596_v25 }
 0x176   :  { %v2638_v11 = vpop.f32.mrf.mxu0  ;;  %v2679_v13 = vpop.f32.mrf.mxu1 }
 0x177   :  { %v2678_v35 = vadd.f32 %v2677_v10, %v2637_v29 }
 0x178   :  { %v2715_v14 = vpop.f32.mrf.mxu0  ;;  %v2756_v16 = vpop.f32.mrf.mxu1 }
 0x179   :  { %v2716_v32 = vadd.f32 %v2715_v14, %v2675_v28 }
 0x17a   :  { %v2717_v17 = vpop.f32.mrf.mxu0  ;;  %v2758_v20 = vpop.f32.mrf.mxu1 }
 0x17b   :  { %v2757_v38 = vadd.f32 %v2756_v16, %v2716_v32 }
 0x17c   :  { %v2718_v21 = vpop.f32.mrf.mxu0  ;;  %v2759_v23 = vpop.f32.mrf.mxu1 }
 0x17d   :  { %v2719_v39 = vadd.f32 %v2718_v21, %v2678_v35 }
 0x17e   :  { %v2720_v24 = vpop.f32.mrf.mxu0  ;;  %v2761_v26 = vpop.f32.mrf.mxu1 }
 0x17f   :  { %v2760_v45 = vadd.f32 %v2759_v23, %v2719_v39 }
 0x180   :  { %v2797_v27 = vpop.f32.mrf.mxu0  ;;  %v2838_v30 = vpop.f32.mrf.mxu1 }
 0x181   :  { %v2798_v42 = vadd.f32 %v2797_v27, %v2757_v38 }
 0x182   :  { %v2799_v31 = vpop.f32.mrf.mxu0  ;;  %v2840_v33 = vpop.f32.mrf.mxu1 }
 0x183   :  { %v2839_v48 = vadd.f32 %v2838_v30, %v2798_v42 }
 0x184   :  { %v2800_v34 = vpop.f32.mrf.mxu0  ;;  %v2841_v36 = vpop.f32.mrf.mxu1 }
 0x185   :  { %v2801_v49 = vadd.f32 %v2800_v34, %v2760_v45 }
 0x186   :  { %v2802_v37 = vpop.f32.mrf.mxu0  ;;  %v2843_v40 = vpop.f32.mrf.mxu1 }
 0x187   :  { %v2842_v55 = vadd.f32 %v2841_v36, %v2801_v49 }
 0x188   :  { %v2879_v41 = vpop.f32.mrf.mxu0  ;;  %v2920_v43 = vpop.f32.mrf.mxu1 }
 0x189   :  { %v2880_v52 = vadd.f32 %v2879_v41, %v2839_v48 }
 0x18a   :  { %v2881_v44 = vpop.f32.mrf.mxu0  ;;  %v2922_v46 = vpop.f32.mrf.mxu1 }
 0x18b   :  { %v2921_v58 = vadd.f32 %v2920_v43, %v2880_v52 }
 0x18c   :  { %v2882_v47 = vpop.f32.mrf.mxu0  ;;  %v2923_v50 = vpop.f32.mrf.mxu1 }
 0x18d   :  { %v2883_v59 = vadd.f32 %v2882_v47, %v2842_v55 }
 0x18e   :  { %v2884_v51 = vpop.f32.mrf.mxu0  ;;  %v2925_v53 = vpop.f32.mrf.mxu1 }
 0x18f   :  { %v2924_v1 = vadd.f32 %v2923_v50, %v2883_v59 }
 0x190   :  { %v2961_v54 = vpop.f32.mrf.mxu0  ;;  %v3002_v56 = vpop.f32.mrf.mxu1 }
 0x191   :  { %v2962_v62 = vadd.f32 %v2961_v54, %v2921_v58 }
 0x192   :  { %v2963_v57 = vpop.f32.mrf.mxu0  ;;  %v3004_v60 = vpop.f32.mrf.mxu1 }
 0x193   :  { %v3003_v4 = vadd.f32 %v3002_v56, %v2962_v62 }
 0x194   :  { %v2964_v61 = vpop.f32.mrf.mxu0  ;;  %v3005_v63 = vpop.f32.mrf.mxu1 }
 0x195   :  { %v2965_v5 = vadd.f32 %v2964_v61, %v2924_v1 }
 0x196   :  { %v2966_v0 = vpop.f32.mrf.mxu0  ;;  %v3007_v2 = vpop.f32.mrf.mxu1 }
 0x197   :  { %v3006_v11 = vadd.f32 %v3005_v63, %v2965_v5 }
 0x198   :  { %v3043_v3 = vpop.f32.mrf.mxu0  ;;  %v3084_v6 = vpop.f32.mrf.mxu1 }
 0x199   :  { %v3044_v8 = vadd.f32 %v3043_v3, %v3003_v4 }
 0x19a   :  { %v3045_v7 = vpop.f32.mrf.mxu0  ;;  %v3086_v9 = vpop.f32.mrf.mxu1 }
 0x19b   :  { %v3085_v14 = vadd.f32 %v3084_v6, %v3044_v8 }
 0x19c   :  { %v3046_v10 = vpop.f32.mrf.mxu0  ;;  %v3087_v12 = vpop.f32.mrf.mxu1 }
 0x19d   :  { %v3047_v15 = vadd.f32 %v3046_v10, %v3006_v11 }
 0x19e   :  { %v3048_v13 = vpop.f32.mrf.mxu0  ;;  %v3089_v16 = vpop.f32.mrf.mxu1 }
 0x19f   :  { %v3088_v21 = vadd.f32 %v3087_v12, %v3047_v15 }
 0x1a0   :  { %v3125_v17 = vpop.f32.mrf.mxu0  ;;  %v3166_v19 = vpop.f32.mrf.mxu1 }
 0x1a1   :  { %v3126_v18 = vadd.f32 %v3125_v17, %v3085_v14 }
 0x1a2   :  { %v3127_v20 = vpop.f32.mrf.mxu0  ;;  %v3168_v23 = vpop.f32.mrf.mxu1 }
 0x1a3   :  { %v3167_v22 = vadd.f32 %v3166_v19, %v3126_v18 }
 0x1a4   :  { %v3128_v24 = vpop.f32.mrf.mxu0  ;;  %v3169_v26 = vpop.f32.mrf.mxu1 }
 0x1a5   :  { %3174 = vst.msk [vmem:[#allocation7] sm:$0xff] %vm3173_vm0, %v3167_v22  ;;  %v3129_v25 = vadd.f32 %v3128_v24, %v3088_v21 }
 0x1a6   :  { %v3130_v27 = vpop.f32.mrf.mxu0  ;;  %v3171_v29 = vpop.f32.mrf.mxu1 }
 0x1a7   :  { %v3170_v28 = vadd.f32 %v3169_v26, %v3129_v25 }
 0x1a9   :  { %3175 = vst.msk [vmem:[#allocation7 + $0x8] sm:$0xff] %vm3173_vm0, %v3170_v28 }
 0x1aa   :  { %3444 = shalt.err (!%p3441_p0)
}
 0x1ab   :  { %s3464_s22 = smov 128   ;;  %s3465_s23 = smov 8  }
 0x1ac   :  { %3187 = dma.vmem_to_hbm [thread:$0]  %s3182_s1, 256, %s3492_s2, [#allocation4], %s3464_s22, %s3464_s22, %s3465_s23  }
 0x1ad   :  { %3457 = dma.done.wait [#allocation4], 256  }
 0x1ae   :  { %3458 = vsyncadd [#allocation4], 4294967040 }
 0x1af   :  { %3191 = vsyncpa [#allocation3], 1 }
 0x1b0   :  { %3192 = vsyncpa [#allocation6], 1 }
 0x1b1   :  { %3193 = vsyncpa [#allocation4], 1 }

</bundles_post_ra>
